<compile_context>
chip_gen: v5e
topology: v5e:2x2
jax: 0.10.0
libtpu: 0.0.40
codegen_flags: <defaults>
</compile_context>

<pallas_src>
import jax
import jax.numpy as jnp
from jax.experimental import pallas as pl
from jax.experimental.pallas import tpu as pltpu

EPS = 1e-5
# Set to jnp.bfloat16 on v6e/v7x at production channel counts.
MXU_DTYPE = jnp.float32


def _resblock_kernel(x_ref, w1_ref, w2_ref, wd_ref, af_ref,
                     g1_ref, b1_ref, g2_ref, b2_ref, gd_ref, bd_ref,
                     o_ref, xh_ref, y1h_ref):
    # x_ref  : (N, H, W*Cin)            input rows (no spatial padding)
    # w1_ref : (3, W*Cin,  W*Cout)      conv1 banded row weights (one per kh)
    # w2_ref : (3, W*Cout, W*Cout)      conv2 banded row weights
    # wd_ref : (W*Cin, W*Cout)          downsample 1x1 conv as block-diag matmul
    # af_ref : (W*Cout, W*Cout)         BN fold matrix: sum over W per channel,
    #                                   /(N*H*W), re-broadcast over W positions
    # g*/b*  : (1, W*Cout)              BN gamma/beta tiled over W
    # o_ref  : (N, H, W*Cout)           lane-dense output rows
    # xh_ref : (N, H+2, W*Cin)          scratch: input rows with zero H-halo
    # y1h_ref: (N, H+2, W*Cout)         scratch: conv1 output rows with zero H-halo
    N, H, WCin = x_ref.shape
    WCout = o_ref.shape[-1]
    NH = N * H

    def bn(acc, g_ref, b_ref):
        # Single-pass per-channel batchnorm over (N,H,W) in the interleaved
        # (row, W*Cout) layout: sublane-reduce rows, then one matmul with af_ref
        # folds over W per channel, divides by N*H*W and re-broadcasts.
        # f32 accumulation; E[x^2]-E[x]^2 is safe at these magnitudes.
        rsum = jnp.sum(acc, axis=0, keepdims=True)            # (1, W*Cout)
        rsq = jnp.sum(acc * acc, axis=0, keepdims=True)       # (1, W*Cout)
        mean = jnp.dot(rsum, af_ref[...], preferred_element_type=jnp.float32)
        ex2 = jnp.dot(rsq, af_ref[...], preferred_element_type=jnp.float32)
        var = ex2 - mean * mean                                # biased (PyTorch)
        inv = jax.lax.rsqrt(var + EPS)
        return (acc - mean) * (inv * g_ref[...]) + b_ref[...]

    # ---- stage input rows with a zero H-halo (W halo is inside the bands) ----
    xh_ref[:, 1:1 + H, :] = x_ref[...]
    xh_ref[:, 0:1, :] = jnp.zeros((N, 1, WCin), jnp.float32)
    xh_ref[:, H + 1:H + 2, :] = jnp.zeros((N, 1, WCin), jnp.float32)

    # ---- conv1: 3 row matmuls (kh taps); kw/Cin/W-pad folded into w1_ref ----
    acc1 = jnp.zeros((NH, WCout), jnp.float32)
    for dh in range(3):
        rows = xh_ref[:, dh:dh + H, :].reshape(NH, WCin)
        acc1 = acc1 + jnp.dot(rows.astype(w1_ref.dtype), w1_ref[dh],
                              preferred_element_type=jnp.float32)
    y1 = jnp.maximum(bn(acc1, g1_ref, b1_ref), 0.0)            # bn1 + relu

    # ---- stage conv1 output with a zero H-halo, then conv2 ----
    y1h_ref[:, 1:1 + H, :] = y1.reshape(N, H, WCout)
    y1h_ref[:, 0:1, :] = jnp.zeros((N, 1, WCout), jnp.float32)
    y1h_ref[:, H + 1:H + 2, :] = jnp.zeros((N, 1, WCout), jnp.float32)

    acc2 = jnp.zeros((NH, WCout), jnp.float32)
    for dh in range(3):
        rows = y1h_ref[:, dh:dh + H, :].reshape(NH, WCout)
        acc2 = acc2 + jnp.dot(rows.astype(w2_ref.dtype), w2_ref[dh],
                              preferred_element_type=jnp.float32)
    y2 = bn(acc2, g2_ref, b2_ref)                              # bn2

    # ---- downsample: 1x1 conv = one matmul on the unshifted rows (no reslice) ----
    xrows = x_ref[...].reshape(NH, WCin)
    accd = jnp.dot(xrows.astype(wd_ref.dtype), wd_ref[...],
                   preferred_element_type=jnp.float32)
    yd = bn(accd, gd_ref, bd_ref)

    # ---- residual add + relu; lane-dense (128-wide) store ----
    o_ref[...] = jnp.maximum(y2 + yd, 0.0).reshape(N, H, WCout)


def residual_block_forward(x_nchw, params):
    """x_nchw: (N, Cin, H, W) float32 -> (N, Cout, H, W) float32."""
    x = jnp.transpose(x_nchw, (0, 2, 3, 1)).astype(jnp.float32)   # NCHW -> NHWC
    N, H, W, Cin = x.shape
    Cout = params["w1"].shape[-1]
    WCin, WCout = W * Cin, W * Cout

    x_rows = x.reshape(N, H, WCin)                                # row layout

    def band(w):
        # (3, 3, ci, co) -> (3, W*ci, W*co): block-banded row weights.
        # band[dh][wi*ci + c, wo*co + d] = w[dh, wi-wo+1, c, d] (0 elsewhere),
        # which also implements the W-direction zero padding.
        shifts = [jnp.eye(W, k=1 - kk, dtype=jnp.float32) for kk in range(3)]
        return jnp.stack([
            sum(jnp.kron(shifts[kk], w[dh, kk]) for kk in range(3))
            for dh in range(3)])

    w1b = band(params["w1"]).astype(MXU_DTYPE)                    # (3, W*Cin,  W*Cout)
    w2b = band(params["w2"]).astype(MXU_DTYPE)                    # (3, W*Cout, W*Cout)
    wdb = jnp.kron(jnp.eye(W, dtype=jnp.float32),
                   params["wd"]).astype(MXU_DTYPE)                # (W*Cin, W*Cout)
    afold = (jnp.kron(jnp.ones((W, W), jnp.float32),
                      jnp.eye(Cout, dtype=jnp.float32)) / float(N * H * W))

    def tile_c(v):  # (Cout,) -> (1, W*Cout) broadcast over W positions
        return jnp.tile(v.astype(jnp.float32), W).reshape(1, WCout)

    g1, b1 = tile_c(params["g1"]), tile_c(params["b1"])
    g2, b2 = tile_c(params["g2"]), tile_c(params["b2"])
    gd, bd = tile_c(params["gd"]), tile_c(params["bd"])

    vmem = pl.BlockSpec(memory_space=pltpu.MemorySpace.VMEM)
    out_rows = pl.pallas_call(
        _resblock_kernel,
        out_shape=jax.ShapeDtypeStruct((N, H, WCout), jnp.float32),
        in_specs=[vmem] * 11,
        out_specs=vmem,
        scratch_shapes=[pltpu.VMEM((N, H + 2, WCin), jnp.float32),
                        pltpu.VMEM((N, H + 2, WCout), jnp.float32)],
        # Explicit VMEM budget (well under v7x's 64 MiB physical); actual usage
        # here is < 1 MiB.
        compiler_params=pltpu.CompilerParams(vmem_limit_bytes=32 * 1024 * 1024),
    )(x_rows, w1b, w2b, wdb, afold, g1, b1, g2, b2, gd, bd)

    out = out_rows.reshape(N, H, W, Cout)
    return jnp.transpose(out, (0, 3, 1, 2))                       # NHWC -> NCHW


def ref_forward(x_nchw, p):
    """Pure-JAX reference mirroring the PyTorch forward (train-mode BN)."""
    x = jnp.transpose(x_nchw, (0, 2, 3, 1)).astype(jnp.float32)

    def conv3(z, w):
        return jax.lax.conv_general_dilated(
            z, w, (1, 1), ((1, 1), (1, 1)),
            dimension_numbers=("NHWC", "HWIO", "NHWC"))

    def bn(y, g, b):
        m = jnp.mean(y, axis=(0, 1, 2), keepdims=True)
        v = jnp.mean((y - m) ** 2, axis=(0, 1, 2), keepdims=True)
        return (y - m) / jnp.sqrt(v + EPS) * g + b

    out = jax.nn.relu(bn(conv3(x, p["w1"]), p["g1"], p["b1"]))
    out = bn(conv3(out, p["w2"]), p["g2"], p["b2"])
    ident = bn(jnp.einsum("nhwc,cd->nhwd", x, p["wd"]), p["gd"], p["bd"])
    out = jax.nn.relu(out + ident)
    return jnp.transpose(out, (0, 3, 1, 2))


if __name__ == "__main__":
    N, Cin, Cout, H, W = 2, 4, 8, 16, 16   # in_channels=4, out_channels=8, stride=1
    key = jax.random.PRNGKey(0)
    ks = jax.random.split(key, 11)

    params = {
        "w1": 0.1 * jax.random.normal(ks[0], (3, 3, Cin, Cout), jnp.float32),
        "g1": 1.0 + 0.1 * jax.random.normal(ks[1], (Cout,), jnp.float32),
        "b1": 0.1 * jax.random.normal(ks[2], (Cout,), jnp.float32),
        "w2": 0.1 * jax.random.normal(ks[3], (3, 3, Cout, Cout), jnp.float32),
        "g2": 1.0 + 0.1 * jax.random.normal(ks[4], (Cout,), jnp.float32),
        "b2": 0.1 * jax.random.normal(ks[5], (Cout,), jnp.float32),
        "wd": 0.1 * jax.random.normal(ks[6], (Cin, Cout), jnp.float32),
        "gd": 1.0 + 0.1 * jax.random.normal(ks[7], (Cout,), jnp.float32),
        "bd": 0.1 * jax.random.normal(ks[8], (Cout,), jnp.float32),
    }
    x = jax.random.normal(ks[10], (N, Cin, H, W), jnp.float32)

    out = jax.block_until_ready(residual_block_forward(x, params))
    ref = ref_forward(x, params)

    assert out.shape == (N, Cout, H, W), out.shape
    max_err = float(jnp.max(jnp.abs(out - ref)))
    if max_err > 1e-3:
        raise SystemExit(f"mismatch vs reference: max_err={max_err}")
    print("KERNEL_OK")
</pallas_src>

<mosaic_0001>
module attributes {stable_mosaic.version = 11 : i64} {
  func.func @_resblock_kernel(%arg0: memref<2x16x64xf32, #tpu.memory_space<vmem>>, %arg1: memref<3x64x128xf32, #tpu.memory_space<vmem>>, %arg2: memref<3x128x128xf32, #tpu.memory_space<vmem>>, %arg3: memref<64x128xf32, #tpu.memory_space<vmem>>, %arg4: memref<128x128xf32, #tpu.memory_space<vmem>>, %arg5: memref<1x128xf32, #tpu.memory_space<vmem>>, %arg6: memref<1x128xf32, #tpu.memory_space<vmem>>, %arg7: memref<1x128xf32, #tpu.memory_space<vmem>>, %arg8: memref<1x128xf32, #tpu.memory_space<vmem>>, %arg9: memref<1x128xf32, #tpu.memory_space<vmem>>, %arg10: memref<1x128xf32, #tpu.memory_space<vmem>>, %arg11: memref<2x16x128xf32, #tpu.memory_space<vmem>>, %arg12: memref<2x18x64xf32, #tpu.memory_space<vmem>>, %arg13: memref<2x18x128xf32, #tpu.memory_space<vmem>>) attributes {dimension_semantics = [], scalar_prefetch = 0 : i64, scratch_operands = 2 : i64, tpu.core_type = #tpu.core_type<tc>} {
    %c0 = arith.constant 0 : index
    %c0_0 = arith.constant 0 : index
    %c0_1 = arith.constant 0 : index
    %0 = vector.load %arg0[%c0, %c0_0, %c0_1] : memref<2x16x64xf32, #tpu.memory_space<vmem>>, vector<2x16x64xf32>
    %c0_2 = arith.constant 0 : index
    %c1 = arith.constant 1 : index
    %c0_3 = arith.constant 0 : index
    %1 = vector.load %arg12[%c0_2, %c1, %c0_3] : memref<2x18x64xf32, #tpu.memory_space<vmem>>, vector<2x16x64xf32>
    tpu.vector_store %arg12[%c0_2, %c1, %c0_3], %0 {strides = array<i32>} : memref<2x18x64xf32, #tpu.memory_space<vmem>>, vector<2x16x64xf32>,
    %cst = arith.constant 0.000000e+00 : f32
    %2 = vector.broadcast %cst : f32 to vector<2x1x64xf32>
    %c0_4 = arith.constant 0 : index
    %c0_5 = arith.constant 0 : index
    %c0_6 = arith.constant 0 : index
    %3 = vector.load %arg12[%c0_4, %c0_5, %c0_6] : memref<2x18x64xf32, #tpu.memory_space<vmem>>, vector<2x1x64xf32>
    tpu.vector_store %arg12[%c0_4, %c0_5, %c0_6], %2 {strides = array<i32>} : memref<2x18x64xf32, #tpu.memory_space<vmem>>, vector<2x1x64xf32>,
    %cst_7 = arith.constant 0.000000e+00 : f32
    %4 = vector.broadcast %cst_7 : f32 to vector<2x1x64xf32>
    %c0_8 = arith.constant 0 : index
    %c17 = arith.constant 17 : index
    %c0_9 = arith.constant 0 : index
    %5 = vector.load %arg12[%c0_8, %c17, %c0_9] : memref<2x18x64xf32, #tpu.memory_space<vmem>>, vector<2x1x64xf32>
    tpu.vector_store %arg12[%c0_8, %c17, %c0_9], %4 {strides = array<i32>} : memref<2x18x64xf32, #tpu.memory_space<vmem>>, vector<2x1x64xf32>,
    %cst_10 = arith.constant 0.000000e+00 : f32
    %6 = vector.broadcast %cst_10 : f32 to vector<32x128xf32>
    %c0_11 = arith.constant 0 : index
    %c0_12 = arith.constant 0 : index
    %c0_13 = arith.constant 0 : index
    %7 = vector.load %arg12[%c0_11, %c0_12, %c0_13] : memref<2x18x64xf32, #tpu.memory_space<vmem>>, vector<2x16x64xf32>
    %8 = vector.shape_cast %7 : vector<2x16x64xf32> to vector<32x64xf32>
    %c0_14 = arith.constant 0 : index
    %c0_15 = arith.constant 0 : index
    %c0_16 = arith.constant 0 : index
    %9 = vector.load %arg1[%c0_14, %c0_15, %c0_16] : memref<3x64x128xf32, #tpu.memory_space<vmem>>, vector<1x64x128xf32>
    %10 = vector.shape_cast %9 : vector<1x64x128xf32> to vector<64x128xf32>
    %cst_17 = arith.constant dense<0.000000e+00> : vector<32x128xf32>
    %11 = tpu.matmul %8, %10, %cst_17 {dimension_numbers = #tpu.dot_dimension_numbers<[1], [0], [0], [1], [0, 0, 1, 1], [], []>} : vector<32x64xf32>, vector<64x128xf32>, vector<32x128xf32> -> vector<32x128xf32>
    %12 = arith.addf %6, %11 : vector<32x128xf32>
    %c0_18 = arith.constant 0 : index
    %c1_19 = arith.constant 1 : index
    %c0_20 = arith.constant 0 : index
    %13 = vector.load %arg12[%c0_18, %c1_19, %c0_20] : memref<2x18x64xf32, #tpu.memory_space<vmem>>, vector<2x16x64xf32>
    %14 = vector.shape_cast %13 : vector<2x16x64xf32> to vector<32x64xf32>
    %c1_21 = arith.constant 1 : index
    %c0_22 = arith.constant 0 : index
    %c0_23 = arith.constant 0 : index
    %15 = vector.load %arg1[%c1_21, %c0_22, %c0_23] : memref<3x64x128xf32, #tpu.memory_space<vmem>>, vector<1x64x128xf32>
    %16 = vector.shape_cast %15 : vector<1x64x128xf32> to vector<64x128xf32>
    %cst_24 = arith.constant dense<0.000000e+00> : vector<32x128xf32>
    %17 = tpu.matmul %14, %16, %cst_24 {dimension_numbers = #tpu.dot_dimension_numbers<[1], [0], [0], [1], [0, 0, 1, 1], [], []>} : vector<32x64xf32>, vector<64x128xf32>, vector<32x128xf32> -> vector<32x128xf32>
    %18 = arith.addf %12, %17 : vector<32x128xf32>
    %c0_25 = arith.constant 0 : index
    %c2 = arith.constant 2 : index
    %c0_26 = arith.constant 0 : index
    %19 = vector.load %arg12[%c0_25, %c2, %c0_26] : memref<2x18x64xf32, #tpu.memory_space<vmem>>, vector<2x16x64xf32>
    %20 = vector.shape_cast %19 : vector<2x16x64xf32> to vector<32x64xf32>
    %c2_27 = arith.constant 2 : index
    %c0_28 = arith.constant 0 : index
    %c0_29 = arith.constant 0 : index
    %21 = vector.load %arg1[%c2_27, %c0_28, %c0_29] : memref<3x64x128xf32, #tpu.memory_space<vmem>>, vector<1x64x128xf32>
    %22 = vector.shape_cast %21 : vector<1x64x128xf32> to vector<64x128xf32>
    %cst_30 = arith.constant dense<0.000000e+00> : vector<32x128xf32>
    %23 = tpu.matmul %20, %22, %cst_30 {dimension_numbers = #tpu.dot_dimension_numbers<[1], [0], [0], [1], [0, 0, 1, 1], [], []>} : vector<32x64xf32>, vector<64x128xf32>, vector<32x128xf32> -> vector<32x128xf32>
    %24 = arith.addf %18, %23 : vector<32x128xf32>
    %cst_31 = arith.constant dense<0.000000e+00> : vector<128xf32>
    %25 = vector.multi_reduction <add>, %24, %cst_31 [0] : vector<32x128xf32> to vector<128xf32>
    %26 = vector.shape_cast %25 : vector<128xf32> to vector<1x128xf32>
    %27 = arith.mulf %24, %24 : vector<32x128xf32>
    %cst_32 = arith.constant dense<0.000000e+00> : vector<128xf32>
    %28 = vector.multi_reduction <add>, %27, %cst_32 [0] : vector<32x128xf32> to vector<128xf32>
    %29 = vector.shape_cast %28 : vector<128xf32> to vector<1x128xf32>
    %c0_33 = arith.constant 0 : index
    %c0_34 = arith.constant 0 : index
    %30 = vector.load %arg4[%c0_33, %c0_34] : memref<128x128xf32, #tpu.memory_space<vmem>>, vector<128x128xf32>
    %cst_35 = arith.constant dense<0.000000e+00> : vector<1x128xf32>
    %31 = tpu.matmul %26, %30, %cst_35 {dimension_numbers = #tpu.dot_dimension_numbers<[1], [0], [0], [1], [0, 0, 1, 1], [], []>} : vector<1x128xf32>, vector<128x128xf32>, vector<1x128xf32> -> vector<1x128xf32>
    %c0_36 = arith.constant 0 : index
    %c0_37 = arith.constant 0 : index
    %32 = vector.load %arg4[%c0_36, %c0_37] : memref<128x128xf32, #tpu.memory_space<vmem>>, vector<128x128xf32>
    %cst_38 = arith.constant dense<0.000000e+00> : vector<1x128xf32>
    %33 = tpu.matmul %29, %32, %cst_38 {dimension_numbers = #tpu.dot_dimension_numbers<[1], [0], [0], [1], [0, 0, 1, 1], [], []>} : vector<1x128xf32>, vector<128x128xf32>, vector<1x128xf32> -> vector<1x128xf32>
    %34 = arith.mulf %31, %31 : vector<1x128xf32>
    %35 = arith.subf %33, %34 : vector<1x128xf32>
    %cst_39 = arith.constant 9.99999974E-6 : f32
    %36 = vector.broadcast %cst_39 : f32 to vector<1x128xf32>
    %37 = arith.addf %35, %36 : vector<1x128xf32>
    %38 = math.rsqrt %37 : vector<1x128xf32>
    %39 = vector.broadcast %31 : vector<1x128xf32> to vector<32x128xf32>
    %40 = arith.subf %24, %39 : vector<32x128xf32>
    %c0_40 = arith.constant 0 : index
    %c0_41 = arith.constant 0 : index
    %41 = vector.load %arg5[%c0_40, %c0_41] : memref<1x128xf32, #tpu.memory_space<vmem>>, vector<1x128xf32>
    %42 = arith.mulf %38, %41 : vector<1x128xf32>
    %43 = vector.broadcast %42 : vector<1x128xf32> to vector<32x128xf32>
    %44 = arith.mulf %40, %43 : vector<32x128xf32>
    %c0_42 = arith.constant 0 : index
    %c0_43 = arith.constant 0 : index
    %45 = vector.load %arg6[%c0_42, %c0_43] : memref<1x128xf32, #tpu.memory_space<vmem>>, vector<1x128xf32>
    %46 = vector.broadcast %45 : vector<1x128xf32> to vector<32x128xf32>
    %47 = arith.addf %44, %46 : vector<32x128xf32>
    %cst_44 = arith.constant 0.000000e+00 : f32
    %48 = vector.broadcast %cst_44 : f32 to vector<32x128xf32>
    %49 = arith.maximumf %47, %48 : vector<32x128xf32>
    %50 = vector.shape_cast %49 : vector<32x128xf32> to vector<2x16x128xf32>
    %c0_45 = arith.constant 0 : index
    %c1_46 = arith.constant 1 : index
    %c0_47 = arith.constant 0 : index
    %51 = vector.load %arg13[%c0_45, %c1_46, %c0_47] : memref<2x18x128xf32, #tpu.memory_space<vmem>>, vector<2x16x128xf32>
    tpu.vector_store %arg13[%c0_45, %c1_46, %c0_47], %50 {strides = array<i32>} : memref<2x18x128xf32, #tpu.memory_space<vmem>>, vector<2x16x128xf32>,
    %cst_48 = arith.constant 0.000000e+00 : f32
    %52 = vector.broadcast %cst_48 : f32 to vector<2x1x128xf32>
    %c0_49 = arith.constant 0 : index
    %c0_50 = arith.constant 0 : index
    %c0_51 = arith.constant 0 : index
    %53 = vector.load %arg13[%c0_49, %c0_50, %c0_51] : memref<2x18x128xf32, #tpu.memory_space<vmem>>, vector<2x1x128xf32>
    tpu.vector_store %arg13[%c0_49, %c0_50, %c0_51], %52 {strides = array<i32>} : memref<2x18x128xf32, #tpu.memory_space<vmem>>, vector<2x1x128xf32>,
    %cst_52 = arith.constant 0.000000e+00 : f32
    %54 = vector.broadcast %cst_52 : f32 to vector<2x1x128xf32>
    %c0_53 = arith.constant 0 : index
    %c17_54 = arith.constant 17 : index
    %c0_55 = arith.constant 0 : index
    %55 = vector.load %arg13[%c0_53, %c17_54, %c0_55] : memref<2x18x128xf32, #tpu.memory_space<vmem>>, vector<2x1x128xf32>
    tpu.vector_store %arg13[%c0_53, %c17_54, %c0_55], %54 {strides = array<i32>} : memref<2x18x128xf32, #tpu.memory_space<vmem>>, vector<2x1x128xf32>,
    %cst_56 = arith.constant 0.000000e+00 : f32
    %56 = vector.broadcast %cst_56 : f32 to vector<32x128xf32>
    %c0_57 = arith.constant 0 : index
    %c0_58 = arith.constant 0 : index
    %c0_59 = arith.constant 0 : index
    %57 = vector.load %arg13[%c0_57, %c0_58, %c0_59] : memref<2x18x128xf32, #tpu.memory_space<vmem>>, vector<2x16x128xf32>
    %58 = vector.shape_cast %57 : vector<2x16x128xf32> to vector<32x128xf32>
    %c0_60 = arith.constant 0 : index
    %c0_61 = arith.constant 0 : index
    %c0_62 = arith.constant 0 : index
    %59 = vector.load %arg2[%c0_60, %c0_61, %c0_62] : memref<3x128x128xf32, #tpu.memory_space<vmem>>, vector<1x128x128xf32>
    %60 = vector.shape_cast %59 : vector<1x128x128xf32> to vector<128x128xf32>
    %cst_63 = arith.constant dense<0.000000e+00> : vector<32x128xf32>
    %61 = tpu.matmul %58, %60, %cst_63 {dimension_numbers = #tpu.dot_dimension_numbers<[1], [0], [0], [1], [0, 0, 1, 1], [], []>} : vector<32x128xf32>, vector<128x128xf32>, vector<32x128xf32> -> vector<32x128xf32>
    %62 = arith.addf %56, %61 : vector<32x128xf32>
    %c0_64 = arith.constant 0 : index
    %c1_65 = arith.constant 1 : index
    %c0_66 = arith.constant 0 : index
    %63 = vector.load %arg13[%c0_64, %c1_65, %c0_66] : memref<2x18x128xf32, #tpu.memory_space<vmem>>, vector<2x16x128xf32>
    %64 = vector.shape_cast %63 : vector<2x16x128xf32> to vector<32x128xf32>
    %c1_67 = arith.constant 1 : index
    %c0_68 = arith.constant 0 : index
    %c0_69 = arith.constant 0 : index
    %65 = vector.load %arg2[%c1_67, %c0_68, %c0_69] : memref<3x128x128xf32, #tpu.memory_space<vmem>>, vector<1x128x128xf32>
    %66 = vector.shape_cast %65 : vector<1x128x128xf32> to vector<128x128xf32>
    %cst_70 = arith.constant dense<0.000000e+00> : vector<32x128xf32>
    %67 = tpu.matmul %64, %66, %cst_70 {dimension_numbers = #tpu.dot_dimension_numbers<[1], [0], [0], [1], [0, 0, 1, 1], [], []>} : vector<32x128xf32>, vector<128x128xf32>, vector<32x128xf32> -> vector<32x128xf32>
    %68 = arith.addf %62, %67 : vector<32x128xf32>
    %c0_71 = arith.constant 0 : index
    %c2_72 = arith.constant 2 : index
    %c0_73 = arith.constant 0 : index
    %69 = vector.load %arg13[%c0_71, %c2_72, %c0_73] : memref<2x18x128xf32, #tpu.memory_space<vmem>>, vector<2x16x128xf32>
    %70 = vector.shape_cast %69 : vector<2x16x128xf32> to vector<32x128xf32>
    %c2_74 = arith.constant 2 : index
    %c0_75 = arith.constant 0 : index
    %c0_76 = arith.constant 0 : index
    %71 = vector.load %arg2[%c2_74, %c0_75, %c0_76] : memref<3x128x128xf32, #tpu.memory_space<vmem>>, vector<1x128x128xf32>
    %72 = vector.shape_cast %71 : vector<1x128x128xf32> to vector<128x128xf32>
    %cst_77 = arith.constant dense<0.000000e+00> : vector<32x128xf32>
    %73 = tpu.matmul %70, %72, %cst_77 {dimension_numbers = #tpu.dot_dimension_numbers<[1], [0], [0], [1], [0, 0, 1, 1], [], []>} : vector<32x128xf32>, vector<128x128xf32>, vector<32x128xf32> -> vector<32x128xf32>
    %74 = arith.addf %68, %73 : vector<32x128xf32>
    %cst_78 = arith.constant dense<0.000000e+00> : vector<128xf32>
    %75 = vector.multi_reduction <add>, %74, %cst_78 [0] : vector<32x128xf32> to vector<128xf32>
    %76 = vector.shape_cast %75 : vector<128xf32> to vector<1x128xf32>
    %77 = arith.mulf %74, %74 : vector<32x128xf32>
    %cst_79 = arith.constant dense<0.000000e+00> : vector<128xf32>
    %78 = vector.multi_reduction <add>, %77, %cst_79 [0] : vector<32x128xf32> to vector<128xf32>
    %79 = vector.shape_cast %78 : vector<128xf32> to vector<1x128xf32>
    %c0_80 = arith.constant 0 : index
    %c0_81 = arith.constant 0 : index
    %80 = vector.load %arg4[%c0_80, %c0_81] : memref<128x128xf32, #tpu.memory_space<vmem>>, vector<128x128xf32>
    %cst_82 = arith.constant dense<0.000000e+00> : vector<1x128xf32>
    %81 = tpu.matmul %76, %80, %cst_82 {dimension_numbers = #tpu.dot_dimension_numbers<[1], [0], [0], [1], [0, 0, 1, 1], [], []>} : vector<1x128xf32>, vector<128x128xf32>, vector<1x128xf32> -> vector<1x128xf32>
    %c0_83 = arith.constant 0 : index
    %c0_84 = arith.constant 0 : index
    %82 = vector.load %arg4[%c0_83, %c0_84] : memref<128x128xf32, #tpu.memory_space<vmem>>, vector<128x128xf32>
    %cst_85 = arith.constant dense<0.000000e+00> : vector<1x128xf32>
    %83 = tpu.matmul %79, %82, %cst_85 {dimension_numbers = #tpu.dot_dimension_numbers<[1], [0], [0], [1], [0, 0, 1, 1], [], []>} : vector<1x128xf32>, vector<128x128xf32>, vector<1x128xf32> -> vector<1x128xf32>
    %84 = arith.mulf %81, %81 : vector<1x128xf32>
    %85 = arith.subf %83, %84 : vector<1x128xf32>
    %cst_86 = arith.constant 9.99999974E-6 : f32
    %86 = vector.broadcast %cst_86 : f32 to vector<1x128xf32>
    %87 = arith.addf %85, %86 : vector<1x128xf32>
    %88 = math.rsqrt %87 : vector<1x128xf32>
    %89 = vector.broadcast %81 : vector<1x128xf32> to vector<32x128xf32>
    %90 = arith.subf %74, %89 : vector<32x128xf32>
    %c0_87 = arith.constant 0 : index
    %c0_88 = arith.constant 0 : index
    %91 = vector.load %arg7[%c0_87, %c0_88] : memref<1x128xf32, #tpu.memory_space<vmem>>, vector<1x128xf32>
    %92 = arith.mulf %88, %91 : vector<1x128xf32>
    %93 = vector.broadcast %92 : vector<1x128xf32> to vector<32x128xf32>
    %94 = arith.mulf %90, %93 : vector<32x128xf32>
    %c0_89 = arith.constant 0 : index
    %c0_90 = arith.constant 0 : index
    %95 = vector.load %arg8[%c0_89, %c0_90] : memref<1x128xf32, #tpu.memory_space<vmem>>, vector<1x128xf32>
    %96 = vector.broadcast %95 : vector<1x128xf32> to vector<32x128xf32>
    %97 = arith.addf %94, %96 : vector<32x128xf32>
    %c0_91 = arith.constant 0 : index
    %c0_92 = arith.constant 0 : index
    %c0_93 = arith.constant 0 : index
    %98 = vector.load %arg0[%c0_91, %c0_92, %c0_93] : memref<2x16x64xf32, #tpu.memory_space<vmem>>, vector<2x16x64xf32>
    %99 = vector.shape_cast %98 : vector<2x16x64xf32> to vector<32x64xf32>
    %c0_94 = arith.constant 0 : index
    %c0_95 = arith.constant 0 : index
    %100 = vector.load %arg3[%c0_94, %c0_95] : memref<64x128xf32, #tpu.memory_space<vmem>>, vector<64x128xf32>
    %cst_96 = arith.constant dense<0.000000e+00> : vector<32x128xf32>
    %101 = tpu.matmul %99, %100, %cst_96 {dimension_numbers = #tpu.dot_dimension_numbers<[1], [0], [0], [1], [0, 0, 1, 1], [], []>} : vector<32x64xf32>, vector<64x128xf32>, vector<32x128xf32> -> vector<32x128xf32>
    %cst_97 = arith.constant dense<0.000000e+00> : vector<128xf32>
    %102 = vector.multi_reduction <add>, %101, %cst_97 [0] : vector<32x128xf32> to vector<128xf32>
    %103 = vector.shape_cast %102 : vector<128xf32> to vector<1x128xf32>
    %104 = arith.mulf %101, %101 : vector<32x128xf32>
    %cst_98 = arith.constant dense<0.000000e+00> : vector<128xf32>
    %105 = vector.multi_reduction <add>, %104, %cst_98 [0] : vector<32x128xf32> to vector<128xf32>
    %106 = vector.shape_cast %105 : vector<128xf32> to vector<1x128xf32>
    %c0_99 = arith.constant 0 : index
    %c0_100 = arith.constant 0 : index
    %107 = vector.load %arg4[%c0_99, %c0_100] : memref<128x128xf32, #tpu.memory_space<vmem>>, vector<128x128xf32>
    %cst_101 = arith.constant dense<0.000000e+00> : vector<1x128xf32>
    %108 = tpu.matmul %103, %107, %cst_101 {dimension_numbers = #tpu.dot_dimension_numbers<[1], [0], [0], [1], [0, 0, 1, 1], [], []>} : vector<1x128xf32>, vector<128x128xf32>, vector<1x128xf32> -> vector<1x128xf32>
    %c0_102 = arith.constant 0 : index
    %c0_103 = arith.constant 0 : index
    %109 = vector.load %arg4[%c0_102, %c0_103] : memref<128x128xf32, #tpu.memory_space<vmem>>, vector<128x128xf32>
    %cst_104 = arith.constant dense<0.000000e+00> : vector<1x128xf32>
    %110 = tpu.matmul %106, %109, %cst_104 {dimension_numbers = #tpu.dot_dimension_numbers<[1], [0], [0], [1], [0, 0, 1, 1], [], []>} : vector<1x128xf32>, vector<128x128xf32>, vector<1x128xf32> -> vector<1x128xf32>
    %111 = arith.mulf %108, %108 : vector<1x128xf32>
    %112 = arith.subf %110, %111 : vector<1x128xf32>
    %cst_105 = arith.constant 9.99999974E-6 : f32
    %113 = vector.broadcast %cst_105 : f32 to vector<1x128xf32>
    %114 = arith.addf %112, %113 : vector<1x128xf32>
    %115 = math.rsqrt %114 : vector<1x128xf32>
    %116 = vector.broadcast %108 : vector<1x128xf32> to vector<32x128xf32>
    %117 = arith.subf %101, %116 : vector<32x128xf32>
    %c0_106 = arith.constant 0 : index
    %c0_107 = arith.constant 0 : index
    %118 = vector.load %arg9[%c0_106, %c0_107] : memref<1x128xf32, #tpu.memory_space<vmem>>, vector<1x128xf32>
    %119 = arith.mulf %115, %118 : vector<1x128xf32>
    %120 = vector.broadcast %119 : vector<1x128xf32> to vector<32x128xf32>
    %121 = arith.mulf %117, %120 : vector<32x128xf32>
    %c0_108 = arith.constant 0 : index
    %c0_109 = arith.constant 0 : index
    %122 = vector.load %arg10[%c0_108, %c0_109] : memref<1x128xf32, #tpu.memory_space<vmem>>, vector<1x128xf32>
    %123 = vector.broadcast %122 : vector<1x128xf32> to vector<32x128xf32>
    %124 = arith.addf %121, %123 : vector<32x128xf32>
    %125 = arith.addf %97, %124 : vector<32x128xf32>
    %cst_110 = arith.constant 0.000000e+00 : f32
    %126 = vector.broadcast %cst_110 : f32 to vector<32x128xf32>
    %127 = arith.maximumf %125, %126 : vector<32x128xf32>
    %128 = vector.shape_cast %127 : vector<32x128xf32> to vector<2x16x128xf32>
    %c0_111 = arith.constant 0 : index
    %c0_112 = arith.constant 0 : index
    %c0_113 = arith.constant 0 : index
    %129 = vector.load %arg11[%c0_111, %c0_112, %c0_113] : memref<2x16x128xf32, #tpu.memory_space<vmem>>, vector<2x16x128xf32>
    tpu.vector_store %arg11[%c0_111, %c0_112, %c0_113], %128 {strides = array<i32>} : memref<2x16x128xf32, #tpu.memory_space<vmem>>, vector<2x16x128xf32>,
    return
  }
}

</mosaic_0001>

<bundles_post_ra>
// kernel: tpu_custom_call.1
= control target key start
LH: loop header
LB: loop body
LE: loop exit
PB: predicated region body
PF: predicated region fallthrough
CT: control target
= control target key end

     0   :  { %16 = vsyncpa [#allocation5], 0  ;;  %s1414_s0 = inlined_call_operand.hbm [shape: f32[2,16,64], index: 0, kind: input, shape index: {}]   ;;  %s1415_s1 = inlined_call_operand.hbm [shape: f32[3,64,128], index: 1, kind: input, shape index: {}]   ;;  %s1416_s2 = inlined_call_operand.hbm [shape: f32[3,128,128], index: 2, kind: input, shape index: {}]   ;;  %s1417_s3 = inlined_call_operand.hbm [shape: f32[64,128], index: 3, kind: input, shape index: {}]   ;;  %s1418_s4 = inlined_call_operand.hbm [shape: f32[128,128], index: 4, kind: input, shape index: {}]   ;;  %s1419_s5 = inlined_call_operand.vmem [shape: f32[1,128], index: 5, kind: input, shape index: {}]   ;;  %s1420_s6 = inlined_call_operand.vmem [shape: f32[1,128], index: 6, kind: input, shape index: {}]   ;;  %s1421_s7 = inlined_call_operand.vmem [shape: f32[1,128], index: 7, kind: input, shape index: {}]   ;;  %s1422_s8 = inlined_call_operand.vmem [shape: f32[1,128], index: 8, kind: input, shape index: {}]   ;;  %s1423_s9 = inlined_call_operand.vmem [shape: f32[1,128], index: 9, kind: input, shape index: {}]   ;;  %s1424_s10 = inlined_call_operand.vmem [shape: f32[1,128], index: 10, kind: input, shape index: {}]   ;;  %s1425_s11 = inlined_call_operand.hbm [shape: f32[2,16,128], index: 11, kind: output, shape index: {}]  }
   0x1   :  { %17 = vsyncpa [#allocation8], 0 }
   0x2   :  { %18 = vsyncpa [#allocation11], 0 }
   0x3   :  { %19 = vsyncpa [#allocation6], 0  ;;  %s37_s19 = sshll.u32 %s1415_s1, 4  ;;  %s1050_s20 = smov [#allocation7]   ;;  %s38_s19 = int_to_ptr.hbm [resolvable:$true] %s37_s19 }
   0x4   :  { %s39_s21 = sshll.u32 %s1050_s20, 4  ;;  %s63_s24 = sshll.u32 %s1417_s3, 4  ;;  %s40_s21 = int_to_ptr.vmem [resolvable:$true] %s39_s21  ;;  %s64_s24 = int_to_ptr.hbm [resolvable:$true] %s63_s24 }
   0x5   :  { %s1051_s25 = smov 128   ;;  %s1052_s26 = smov 8  }
   0x6   :  { %45 = dma.hbm_to_vmem [thread:$0]  %s38_s19, 3072, %s40_s21, [#allocation8], %s1051_s25, %s1051_s25, %s1052_s26  }
   0x7   :  { %s1053_s27 = smov [#allocation10]   ;;  %s24_s1 = sshll.u32 %s1414_s0, 4  ;;  %s25_s1 = int_to_ptr.hbm [resolvable:$true] %s24_s1 }
   0x8   :  { %s65_s28 = sshll.u32 %s1053_s27, 4  ;;  %s50_s13 = sshll.u32 %s1416_s2, 4  ;;  %s66_s28 = int_to_ptr.vmem [resolvable:$true] %s65_s28  ;;  %s51_s13 = int_to_ptr.hbm [resolvable:$true] %s50_s13 }
   0x9   :  { %71 = dma.hbm_to_vmem [thread:$0]  %s64_s24, 1024, %s66_s28, [#allocation11], %s1051_s25, %s1051_s25, %s1052_s26  }
   0xa   :  { %s1054_s14 = smov [#allocation4]   ;;  %s1055_s16 = smov [#allocation9]  }
   0xb   :  { %s26_s15 = sshll.u32 %s1054_s14, 4  ;;  %s52_s0 = sshll.u32 %s1055_s16, 4  ;;  %s27_s15 = int_to_ptr.vmem [resolvable:$true] %s26_s15  ;;  %s53_s0 = int_to_ptr.vmem [resolvable:$true] %s52_s0 }
   0xc   :  { %32 = dma.hbm_to_vmem [thread:$0]  %s25_s1, 512, %s27_s15, [#allocation5], %s1051_s25, %s1051_s25, %s1052_s26  }
   0xd   :  { %s76_s19 = sshll.u32 %s1418_s4, 4  ;;  %s1056_s2 = smov [#allocation12]   ;;  %s77_s19 = int_to_ptr.hbm [resolvable:$true] %s76_s19 }
   0xe   :  { %58 = dma.hbm_to_vmem [thread:$0]  %s51_s13, 6144, %s53_s0, [#allocation8], %s1051_s25, %s1051_s25, %s1052_s26  }
   0xf   :  { %s78_s20 = sshll.u32 %s1056_s2, 4  ;;  %s79_s20 = int_to_ptr.vmem [resolvable:$true] %s78_s20 }
  0x10   :  { %84 = dma.hbm_to_vmem [thread:$0]  %s77_s19, 2048, %s79_s20, [#allocation11], %s1051_s25, %s1051_s25, %s1052_s26  }
  0x11   :  { %1042 = dma.done.wait [#allocation5], 512  }
  0x12   :  { %1043 = vsyncadd [#allocation5], 4294966784 }
  0x13   :  { %1044 = dma.done.wait [#allocation8], 9216  }
  0x14   :  { %1045 = vsyncadd [#allocation8], 4294958080 }
  0x15   :  { %1046 = dma.done.wait [#allocation11], 3072  }
  0x16   :  { %1047 = vsyncadd [#allocation11], 4294964224  ;;  %vm126_vm0 = vcmask 516096   ;;  %v1057_v0 = vmov 0.0   ;;  %v250_v1 = vld [vmem:[#allocation7 + $0xb8] sm:$0xff]  ;;  %v249_v2 = vld [vmem:[#allocation7 + $0xb0] sm:$0xff] }
  0x17   :  { %127 = vst.msk [vmem:[#allocation2] sm:$0x1] %vm126_vm0, %v1057_v0  ;;  %v155_v3 = vld [vmem:[#allocation7 + $0x78] sm:$0xff]  ;;  %271 = vmatpush.msra.mxu2 %v250_v1  ;;  %v154_v5 = vld [vmem:[#allocation7 + $0x70] sm:$0xff]  ;;  %v248_v6 = vld [vmem:[#allocation7 + $0xa8] sm:$0xff]  ;;  %vm121_vm1 = vcmask 523264  }
  0x18   :  { %128 = vst.msk [vmem:[#allocation2 + $0x18] sm:$0x1] %vm126_vm0, %v1057_v0  ;;  %176 = vmatpush.msra.mxu0 %v155_v3  ;;  %v142_v4 = vld [vmem:[#allocation7 + $0x38] sm:$0xff]  ;;  %v141_v7 = vld [vmem:[#allocation7 + $0x30] sm:$0xff]  ;;  %v153_v8 = vld [vmem:[#allocation7 + $0x68] sm:$0xff]  ;;  %s849_s3 = sshll.u32 %s1425_s11, 4  ;;  %s850_s3 = int_to_ptr.hbm [resolvable:$true] %s849_s3 }
  0x19   :  { %129 = vst.msk [vmem:[#allocation2 + $0x11] sm:$0x1] %vm126_vm0, %v1057_v0  ;;  %217 = vmatpush.msra.mxu1 %v142_v4  ;;  %272 = vmatpush.msra.mxu2 %v249_v2  ;;  %v140_v9 = vld [vmem:[#allocation7 + $0x28] sm:$0xff]  ;;  %v247_v10 = vld [vmem:[#allocation7 + $0xa0] sm:$0xff]  ;;  %v246_v13 = vld [vmem:[#allocation7 + $0x98] sm:$0xff] }
  0x1a   :  { %130 = vst.msk [vmem:[#allocation2 + $0x29] sm:$0x1] %vm126_vm0, %v1057_v0  ;;  %177 = vmatpush.msra.mxu0 %v154_v5  ;;  %v152_v11 = vld [vmem:[#allocation7 + $0x60] sm:$0xff]  ;;  %v151_v14 = vld [vmem:[#allocation7 + $0x58] sm:$0xff]  ;;  %v245_v16 = vld [vmem:[#allocation7 + $0x90] sm:$0xff] }
  0x1b   :  { %415 = vst [vmem:[#allocation3] sm:$0x1] %v1057_v0  ;;  %218 = vmatpush.msra.mxu1 %v141_v7  ;;  %273 = vmatpush.msra.mxu2 %v248_v6  ;;  %v139_v12 = vld [vmem:[#allocation7 + $0x20] sm:$0xff]  ;;  %v138_v17 = vld [vmem:[#allocation7 + $0x18] sm:$0xff]  ;;  %v1151_v18 = vld [vmem:[#allocation4 + $0x8] sm:$0xff] }
  0x1c   :  { %416 = vst [vmem:[#allocation3 + $0x18] sm:$0x1] %v1057_v0  ;;  %178 = vmatpush.msra.mxu0 %v153_v8  ;;  %v1149_v15 = vld [vmem:[#allocation4] sm:$0xff]  ;;  %v150_v19 = vld [vmem:[#allocation7 + $0x50] sm:$0xff]  ;;  %v1159_v22 = vld [vmem:[#allocation4 + $0x18] sm:$0xff] }
  0x1d   :  { %417 = vst [vmem:[#allocation3 + $0x11] sm:$0x1] %v1057_v0  ;;  %219 = vmatpush.msra.mxu1 %v140_v9  ;;  %274 = vmatpush.msra.mxu2 %v247_v10  ;;  %v137_v20 = vld [vmem:[#allocation7 + $0x10] sm:$0xff]  ;;  %v244_v23 = vld [vmem:[#allocation7 + $0x88] sm:$0xff]  ;;  %v243_v26 = vld [vmem:[#allocation7 + $0x80] sm:$0xff] }
  0x1e   :  { %418 = vst [vmem:[#allocation3 + $0x29] sm:$0x1] %v1057_v0  ;;  %179 = vmatpush.msra.mxu0 %v152_v11  ;;  %v1157_v21 = vld [vmem:[#allocation4 + $0x10] sm:$0xff]  ;;  %v149_v24 = vld [vmem:[#allocation7 + $0x48] sm:$0xff]  ;;  %v148_v27 = vld [vmem:[#allocation7 + $0x40] sm:$0xff] }
  0x1f   :  { %122 = vst.msk [vmem:[#allocation2 + $0x1] sm:$0xff] %vm121_vm1, %v1149_v15  ;;  %220 = vmatpush.msra.mxu1 %v139_v12  ;;  %275 = vmatpush.msra.mxu2 %v246_v13  ;;  %v136_v25 = vld [vmem:[#allocation7 + $0x8] sm:$0xff]  ;;  %v135_v28 = vld [vmem:[#allocation7] sm:$0xff]  ;;  %v1177_v41 = vld [vmem:[#allocation12 + $0x78] sm:$0xff] }
  0x20   :  { %123 = vst.msk [vmem:[#allocation2 + $0x9] sm:$0xff] %vm121_vm1, %v1151_v18  ;;  %180 = vmatpush.msra.mxu0 %v151_v14  ;;  %334 = vmatpush.msra.mxu3 %v1177_v41  ;;  %v1181_v42 = vld [vmem:[#allocation12 + $0x70] sm:$0xff]  ;;  %v1185_v43 = vld [vmem:[#allocation12 + $0x68] sm:$0xff]  ;;  %v1189_v44 = vld [vmem:[#allocation12 + $0x60] sm:$0xff] }
  0x21   :  { %124 = vst.msk [vmem:[#allocation2 + $0x19] sm:$0xff] %vm121_vm1, %v1157_v21  ;;  %221 = vmatpush.msra.mxu1 %v138_v17  ;;  %276 = vmatpush.msra.mxu2 %v245_v16  ;;  %v1193_v45 = vld [vmem:[#allocation12 + $0x58] sm:$0xff]  ;;  %v1197_v46 = vld [vmem:[#allocation12 + $0x50] sm:$0xff]  ;;  %v1201_v47 = vld [vmem:[#allocation12 + $0x48] sm:$0xff] }
  0x22   :  { %125 = vst.msk [vmem:[#allocation2 + $0x21] sm:$0xff] %vm121_vm1, %v1159_v22  ;;  %181 = vmatpush.msra.mxu0 %v150_v19  ;;  %335 = vmatpush.msra.mxu3 %v1181_v42  ;;  %v1205_v48 = vld [vmem:[#allocation12 + $0x40] sm:$0xff]  ;;  %v1209_v49 = vld [vmem:[#allocation12 + $0x38] sm:$0xff]  ;;  %v1213_v52 = vld [vmem:[#allocation12 + $0x30] sm:$0xff] }
  0x23   :  { %222 = vmatpush.msra.mxu1 %v137_v20  ;;  %277 = vmatpush.msra.mxu2 %v244_v23  ;;  %v1217_v53 = vld [vmem:[#allocation12 + $0x28] sm:$0xff]  ;;  %v1221_v54 = vld [vmem:[#allocation12 + $0x20] sm:$0xff]  ;;  %v1223_v55 = vld [vmem:[#allocation12 + $0x18] sm:$0xff] }
  0x24   :  { %182 = vmatpush.msra.mxu0 %v149_v24  ;;  %336 = vmatpush.msra.mxu3 %v1185_v43  ;;  %v1227_v57 = vld [vmem:[#allocation12 + $0x10] sm:$0xff]  ;;  %v1231_v60 = vld [vmem:[#allocation12 + $0x8] sm:$0xff]  ;;  %v1235_v61 = vld [vmem:[#allocation12] sm:$0xff] }
  0x25   :  { %223 = vmatpush.msra.mxu1 %v136_v25  ;;  %278 = vmatpush.msra.mxu2 %v243_v26 }
  0x26   :  { %v143_v29 = vld [vmem:[#allocation2 + $0x1] sm:$0xff]  ;;  %183 = vmatpush.msra.mxu0 %v148_v27  ;;  %337 = vmatpush.msra.mxu3 %v1189_v44 }
  0x27   :  { %v131_v30 = vld [vmem:[#allocation2] sm:$0xff]  ;;  %224 = vmatpush.msra.mxu1 %v135_v28  ;;  %864 = vmatmul.msk.f32.vlgmr.msra.gmra.mxu0 %vm121_vm1, %v143_v29  ;;  %v239_v32 = vld [vmem:[#allocation2 + $0xa] sm:$0xff] }
  0x28   :  { %v238_v31 = vld [vmem:[#allocation2 + $0x2] sm:$0xff]  ;;  %868 = vmatmul.msk.f32.vlgmr.msra.gmra.mxu1 %vm121_vm1, %v131_v30  ;;  %v145_v36 = vld [vmem:[#allocation2 + $0x19] sm:$0xff]  ;;  %354 = vmatpush.msrb.mxu0 %v1177_v41 }
  0x29   :  { %872 = vmatmul.msk.f32.vlgmr.msra.gmra.mxu2 %vm121_vm1, %v238_v31  ;;  %v144_v33 = vld [vmem:[#allocation2 + $0x9] sm:$0xff]  ;;  %v240_v35 = vld [vmem:[#allocation2 + $0x1a] sm:$0xff]  ;;  %338 = vmatpush.msra.mxu3 %v1193_v45 }
  0x2a   :  { %v132_v34 = vld [vmem:[#allocation2 + $0x8] sm:$0xff]  ;;  %v133_v37 = vld [vmem:[#allocation2 + $0x18] sm:$0xff]  ;;  %v134_v40 = vld [vmem:[#allocation2 + $0x20] sm:$0xff]  ;;  %355 = vmatpush.msrb.mxu0 %v1181_v42 }
  0x2b   :  { %v241_v38 = vld [vmem:[#allocation2 + $0x22] sm:$0xff]  ;;  %339 = vmatpush.msra.mxu3 %v1197_v46 }
  0x2c   :  { %v146_v39 = vld [vmem:[#allocation2 + $0x21] sm:$0xff]  ;;  %356 = vmatpush.msrb.mxu0 %v1185_v43 }
  0x2d   :  { %340 = vmatpush.msra.mxu3 %v1201_v47 }
  0x2e   :  { %357 = vmatpush.msrb.mxu0 %v1189_v44 }
  0x2f   :  { %865 = vmatmul.msk.f32.gmra.mxu0 %vm121_vm1, %v144_v33  ;;  %341 = vmatpush.msra.mxu3 %v1205_v48 }
  0x30   :  { %869 = vmatmul.msk.f32.gmra.mxu1 %vm121_vm1, %v132_v34  ;;  %358 = vmatpush.msrb.mxu0 %v1193_v45 }
  0x31   :  { %873 = vmatmul.msk.f32.gmra.mxu2 %vm121_vm1, %v239_v32  ;;  %342 = vmatpush.msra.mxu3 %v1209_v49 }
  0x32   :  { %359 = vmatpush.msrb.mxu0 %v1197_v46 }
  0x33   :  { %343 = vmatpush.msra.mxu3 %v1213_v52 }
  0x34   :  { %360 = vmatpush.msrb.mxu0 %v1201_v47 }
  0x35   :  { %344 = vmatpush.msra.mxu3 %v1217_v53 }
  0x36   :  { %361 = vmatpush.msrb.mxu0 %v1205_v48 }
  0x37   :  { %866 = vmatmul.msk.f32.gmra.mxu0 %vm121_vm1, %v145_v36  ;;  %345 = vmatpush.msra.mxu3 %v1221_v54 }
  0x38   :  { %870 = vmatmul.msk.f32.gmra.mxu1 %vm121_vm1, %v133_v37  ;;  %362 = vmatpush.msrb.mxu0 %v1209_v49 }
  0x39   :  { %874 = vmatmul.msk.f32.gmra.mxu2 %vm121_vm1, %v240_v35  ;;  %346 = vmatpush.msra.mxu3 %v1223_v55 }
  0x3a   :  { %363 = vmatpush.msrb.mxu0 %v1213_v52 }
  0x3b   :  { %347 = vmatpush.msra.mxu3 %v1227_v57 }
  0x3c   :  { %364 = vmatpush.msrb.mxu0 %v1217_v53 }
  0x3d   :  { %348 = vmatpush.msra.mxu3 %v1231_v60 }
  0x3e   :  { %365 = vmatpush.msrb.mxu0 %v1221_v54 }
  0x3f   :  { %867 = vmatmul.msk.f32.gmra.mxu0 %vm121_vm1, %v146_v39  ;;  %349 = vmatpush.msra.mxu3 %v1235_v61  ;;  %v459_v39 = vld [vmem:[#allocation9 + $0xf8] sm:$0xff] }
  0x40   :  { %871 = vmatmul.msk.f32.gmra.mxu1 %vm121_vm1, %v134_v40  ;;  %366 = vmatpush.msrb.mxu0 %v1223_v55  ;;  %v458_v40 = vld [vmem:[#allocation9 + $0xf0] sm:$0xff] }
  0x41   :  { %875 = vmatmul.msk.f32.gmra.mxu2 %vm121_vm1, %v241_v38  ;;  %460 = vmatpush.msrb.mxu1 %v459_v39 }
  0x42   :  { %367 = vmatpush.msrb.mxu0 %v1227_v57 }
  0x43   :  { %461 = vmatpush.msrb.mxu1 %v458_v40  ;;  %v427_v40 = vld [vmem:[#allocation9 + $0x20] sm:$0xff] }
  0x44   :  { %368 = vmatpush.msrb.mxu0 %v1231_v60 }
  0x46   :  { %369 = vmatpush.msrb.mxu0 %v1235_v61 }
  0x48   :  { %610 = vmatpush.msra.mxu0 %v1177_v41 }
  0x4a   :  { %611 = vmatpush.msra.mxu0 %v1181_v42 }
  0x4c   :  { %612 = vmatpush.msra.mxu0 %v1185_v43 }
  0x4e   :  { %613 = vmatpush.msra.mxu0 %v1189_v44 }
  0x50   :  { %614 = vmatpush.msra.mxu0 %v1193_v45 }
  0x52   :  { %615 = vmatpush.msra.mxu0 %v1197_v46 }
  0x54   :  { %616 = vmatpush.msra.mxu0 %v1201_v47 }
  0x56   :  { %617 = vmatpush.msra.mxu0 %v1205_v48 }
  0x58   :  { %618 = vmatpush.msra.mxu0 %v1209_v49 }
  0x5a   :  { %619 = vmatpush.msra.mxu0 %v1213_v52 }
  0x5c   :  { %620 = vmatpush.msra.mxu0 %v1217_v53 }
  0x5e   :  { %621 = vmatpush.msra.mxu0 %v1221_v54 }
  0x60   :  { %622 = vmatpush.msra.mxu0 %v1223_v55 }
  0x62   :  { %623 = vmatpush.msra.mxu0 %v1227_v57 }
  0x64   :  { %624 = vmatpush.msra.mxu0 %v1231_v60 }
  0x66   :  { %625 = vmatpush.msra.mxu0 %v1235_v61 }
  0xa4   :  { %v185_v50 = vpop.f32.mrf.mxu0 }
  0xa5   :  { %v226_v51 = vpop.f32.mrf.mxu1 }
  0xa6   :  { %v227_v2 = vadd.f32 %v226_v51, %v185_v50  ;;  %v457_v50 = vld [vmem:[#allocation9 + $0xe8] sm:$0xff]  ;;  %v456_v51 = vld [vmem:[#allocation9 + $0xe0] sm:$0xff] }
  0xa7   :  { %462 = vmatpush.msrb.mxu1 %v457_v50  ;;  %v527_v50 = vld [vmem:[#allocation9 + $0x120] sm:$0xff] }
  0xa9   :  { %463 = vmatpush.msrb.mxu1 %v456_v51  ;;  %v444_v51 = vld [vmem:[#allocation9 + $0x80] sm:$0xff] }
  0xac   :  { %v280_v56 = vpop.f32.mrf.mxu2  ;;  %v188_v58 = vpop.f32.mrf.mxu0 }
  0xad   :  { %v229_v59 = vpop.f32.mrf.mxu1  ;;  %v1248_v6 = vadd.f32 %v280_v56, %v227_v2  ;;  %v438_v56 = vld [vmem:[#allocation9 + $0x78] sm:$0xff]  ;;  %v536_v2 = vld [vmem:[#allocation9 + $0x168] sm:$0xff] }
  0xae   :  { %v230_v1 = vadd.f32 %v229_v59, %v188_v58  ;;  %v538_v58 = vld [vmem:[#allocation9 + $0x178] sm:$0xff]  ;;  %489 = vmatpush.msrb.mxu2 %v438_v56 }
  0xaf   :  { %v305_v12 = vmul.f32 %v1248_v6, %v1248_v6  ;;  %v455_v59 = vld [vmem:[#allocation9 + $0xd8] sm:$0xff]  ;;  %539 = vmatpush.msrb.mxu3 %v538_v58 }
  0xb0   :  { %464 = vmatpush.msrb.mxu1 %v455_v59  ;;  %v426_v58 = vld [vmem:[#allocation9 + $0x18] sm:$0xff] }
  0xb1   :  { %v526_v59 = vld [vmem:[#allocation9 + $0x118] sm:$0xff] }
  0xb4   :  { %v283_v62 = vpop.f32.mrf.mxu2  ;;  %v191_v63 = vpop.f32.mrf.mxu0 }
  0xb5   :  { %v232_v0 = vpop.f32.mrf.mxu1  ;;  %v1245_v5 = vadd.f32 %v283_v62, %v230_v1  ;;  %v437_v62 = vld [vmem:[#allocation9 + $0x70] sm:$0xff]  ;;  %v436_v1 = vld [vmem:[#allocation9 + $0x68] sm:$0xff] }
  0xb6   :  { %v233_v3 = vadd.f32 %v232_v0, %v191_v63  ;;  %v537_v63 = vld [vmem:[#allocation9 + $0x170] sm:$0xff]  ;;  %490 = vmatpush.msrb.mxu2 %v437_v62 }
  0xb7   :  { %v306_v10 = vmul.f32 %v1245_v5, %v1245_v5  ;;  %v296_v13 = vadd.f32 %v1245_v5, %v1248_v6  ;;  %v454_v0 = vld [vmem:[#allocation9 + $0xd0] sm:$0xff]  ;;  %540 = vmatpush.msrb.mxu3 %v537_v63 }
  0xb8   :  { %465 = vmatpush.msrb.mxu1 %v454_v0  ;;  %491 = vmatpush.msrb.mxu2 %v436_v1  ;;  %v425_v62 = vld [vmem:[#allocation9 + $0x10] sm:$0xff]  ;;  %v424_v0 = vld [vmem:[#allocation9 + $0x8] sm:$0xff] }
  0xb9   :  { %v309_v17 = vadd.f32 %v306_v10, %v305_v12  ;;  %541 = vmatpush.msrb.mxu3 %v536_v2  ;;  %v434_v10 = vld [vmem:[#allocation9 + $0x58] sm:$0xff]  ;;  %v525_v63 = vld [vmem:[#allocation9 + $0x110] sm:$0xff]  ;;  %v524_v1 = vld [vmem:[#allocation9 + $0x108] sm:$0xff] }
  0xba   :  { %v451_v12 = vld [vmem:[#allocation9 + $0xb8] sm:$0xff]  ;;  %v423_v2 = vld [vmem:[#allocation9] sm:$0xff] }
  0xbc   :  { %v286_v4 = vpop.f32.mrf.mxu2  ;;  %v194_v8 = vpop.f32.mrf.mxu0 }
  0xbd   :  { %v1250_v7 = vadd.f32 %v286_v4, %v233_v3  ;;  %v235_v9 = vpop.f32.mrf.mxu1  ;;  %v453_v3 = vld [vmem:[#allocation9 + $0xc8] sm:$0xff]  ;;  %v435_v4 = vld [vmem:[#allocation9 + $0x60] sm:$0xff] }
  0xbe   :  { %v236_v11 = vadd.f32 %v235_v9, %v194_v8  ;;  %v535_v8 = vld [vmem:[#allocation9 + $0x160] sm:$0xff]  ;;  %466 = vmatpush.msrb.mxu1 %v453_v3  ;;  %492 = vmatpush.msrb.mxu2 %v435_v4  ;;  %v694_v4 = vld [vmem:[#allocation10 + $0x38] sm:$0xff] }
  0xbf   :  { %v307_v14 = vmul.f32 %v1250_v7, %v1250_v7  ;;  %v297_v19 = vadd.f32 %v296_v13, %v1250_v7  ;;  %v452_v9 = vld [vmem:[#allocation9 + $0xc0] sm:$0xff]  ;;  %542 = vmatpush.msrb.mxu3 %v535_v8  ;;  %v433_v13 = vld [vmem:[#allocation9 + $0x50] sm:$0xff] }
  0xc0   :  { %467 = vmatpush.msrb.mxu1 %v452_v9  ;;  %493 = vmatpush.msrb.mxu2 %v434_v10  ;;  %v523_v3 = vld [vmem:[#allocation9 + $0x100] sm:$0xff]  ;;  %v693_v9 = vld [vmem:[#allocation10 + $0x30] sm:$0xff] }
  0xc1   :  { %v310_v23 = vadd.f32 %v309_v17, %v307_v14  ;;  %v533_v14 = vld [vmem:[#allocation9 + $0x150] sm:$0xff]  ;;  %v432_v17 = vld [vmem:[#allocation9 + $0x48] sm:$0xff] }
  0xc2   :  { %468 = vmatpush.msrb.mxu1 %v451_v12  ;;  %494 = vmatpush.msrb.mxu2 %v433_v13 }
  0xc4   :  { %v289_v16 = vpop.f32.mrf.mxu2  ;;  %495 = vmatpush.msrb.mxu2 %v432_v17 }
  0xc5   :  { %v1264_v20 = vadd.f32 %v289_v16, %v236_v11  ;;  %v534_v11 = vld [vmem:[#allocation9 + $0x158] sm:$0xff]  ;;  %v450_v16 = vld [vmem:[#allocation9 + $0xb0] sm:$0xff] }
  0xc6   :  { %543 = vmatpush.msrb.mxu3 %v534_v11  ;;  %469 = vmatpush.msrb.mxu1 %v450_v16  ;;  %v691_v16 = vld [vmem:[#allocation10 + $0x20] sm:$0xff] }
  0xc7   :  { %v298_v24 = vadd.f32 %v297_v19, %v1264_v20  ;;  %v308_v25 = vmul.f32 %v1264_v20, %v1264_v20  ;;  %v532_v19 = vld [vmem:[#allocation9 + $0x148] sm:$0xff] }
  0xc8   :  { %544 = vmatpush.msrb.mxu3 %v533_v14  ;;  %v692_v14 = vld [vmem:[#allocation10 + $0x28] sm:$0xff] }
  0xc9   :  { %v299_v26 = vrot.slane %v298_v24, 4  ;;  %v311_v27 = vadd.f32 %v310_v23, %v308_v25  ;;  %v449_v23 = vld [vmem:[#allocation9 + $0xa8] sm:$0xff]  ;;  %v531_v25 = vld [vmem:[#allocation9 + $0x140] sm:$0xff] }
  0xca   :  { %545 = vmatpush.msrb.mxu3 %v532_v19  ;;  %470 = vmatpush.msrb.mxu1 %v449_v23 }
  0xcb   :  { %v312_v28 = vrot.slane %v311_v27, 4  ;;  %v300_v29 = vadd.f32 %v299_v26, %v298_v24  ;;  %v431_v24 = vld [vmem:[#allocation9 + $0x40] sm:$0xff] }
  0xcc   :  { %v448_v26 = vld [vmem:[#allocation9 + $0xa0] sm:$0xff]  ;;  %496 = vmatpush.msrb.mxu2 %v431_v24  ;;  %546 = vmatpush.msrb.mxu3 %v531_v25 }
  0xcd   :  { %v301_v30 = vrot.slane %v300_v29, 2  ;;  %v313_v31 = vadd.f32 %v312_v28, %v311_v27  ;;  %v430_v27 = vld [vmem:[#allocation9 + $0x38] sm:$0xff]  ;;  %471 = vmatpush.msrb.mxu1 %v448_v26 }
  0xce   :  { %v530_v28 = vld [vmem:[#allocation9 + $0x138] sm:$0xff]  ;;  %497 = vmatpush.msrb.mxu2 %v430_v27  ;;  %v889_v27 = vld [vmem:[%s1420_s6] ss:$0 sm:$0xff] }
  0xcf   :  { %v302_v32 = vadd.f32 %v301_v30, %v300_v29  ;;  %v314_v33 = vrot.slane %v313_v31, 2  ;;  %v447_v29 = vld [vmem:[#allocation9 + $0x98] sm:$0xff]  ;;  %547 = vmatpush.msrb.mxu3 %v530_v28  ;;  %v689_v28 = vld [vmem:[#allocation10 + $0x10] sm:$0xff] }
  0xd0   :  { %472 = vmatpush.msrb.mxu1 %v447_v29 }
  0xd1   :  { %v303_v34 = vrot.slane %v302_v32, 1  ;;  %v315_v35 = vadd.f32 %v314_v33, %v313_v31  ;;  %v429_v31 = vld [vmem:[#allocation9 + $0x30] sm:$0xff] }
  0xd2   :  { %v446_v33 = vld [vmem:[#allocation9 + $0x90] sm:$0xff]  ;;  %498 = vmatpush.msrb.mxu2 %v429_v31 }
  0xd3   :  { %v304_v36 = vadd.f32 %v303_v34, %v302_v32  ;;  %v316_v37 = vrot.slane %v315_v35, 1  ;;  %v529_v32 = vld [vmem:[#allocation9 + $0x130] sm:$0xff]  ;;  %473 = vmatpush.msrb.mxu1 %v446_v33 }
  0xd4   :  { %548 = vmatpush.msrb.mxu3 %v529_v32 }
  0xd5   :  { %350 = vmatmul.f32.vlgmr.msra.gmra.mxu3 %v304_v36  ;;  %v317_v38 = vadd.f32 %v316_v37, %v315_v35  ;;  %v428_v36 = vld [vmem:[#allocation9 + $0x28] sm:$0xff] }
  0xd6   :  { %v528_v37 = vld [vmem:[#allocation9 + $0x128] sm:$0xff]  ;;  %499 = vmatpush.msrb.mxu2 %v428_v36 }
  0xd7   :  { %370 = vmatmul.f32.vlgmr.msrb.gmra.mxu0 %v317_v38  ;;  %v445_v38 = vld [vmem:[#allocation9 + $0x88] sm:$0xff]  ;;  %549 = vmatpush.msrb.mxu3 %v528_v37 }
  0xd8   :  { %778 = vmatpush.msrb.mxu0 %v1177_v41  ;;  %474 = vmatpush.msrb.mxu1 %v445_v38 }
  0xd9   :  { %500 = vmatpush.msrb.mxu2 %v427_v40  ;;  %550 = vmatpush.msrb.mxu3 %v527_v50 }
  0xda   :  { %779 = vmatpush.msrb.mxu0 %v1181_v42  ;;  %475 = vmatpush.msrb.mxu1 %v444_v51 }
  0xdb   :  { %501 = vmatpush.msrb.mxu2 %v426_v58  ;;  %551 = vmatpush.msrb.mxu3 %v526_v59 }
  0xdc   :  { %780 = vmatpush.msrb.mxu0 %v1185_v43  ;;  %630 = vmatpush.msra.mxu1 %v1177_v41 }
  0xdd   :  { %502 = vmatpush.msrb.mxu2 %v425_v62  ;;  %552 = vmatpush.msrb.mxu3 %v525_v63 }
  0xde   :  { %781 = vmatpush.msrb.mxu0 %v1189_v44  ;;  %631 = vmatpush.msra.mxu1 %v1181_v42 }
  0xdf   :  { %503 = vmatpush.msrb.mxu2 %v424_v0  ;;  %553 = vmatpush.msrb.mxu3 %v524_v1 }
  0xe0   :  { %782 = vmatpush.msrb.mxu0 %v1193_v45  ;;  %632 = vmatpush.msra.mxu1 %v1185_v43 }
  0xe1   :  { %504 = vmatpush.msrb.mxu2 %v423_v2  ;;  %554 = vmatpush.msrb.mxu3 %v523_v3 }
  0xe2   :  { %783 = vmatpush.msrb.mxu0 %v1197_v46  ;;  %633 = vmatpush.msra.mxu1 %v1189_v44 }
  0xe3   :  { %715 = vmatpush.msra.mxu2 %v694_v4  ;;  %758 = vmatpush.msra.mxu3 %v1177_v41 }
  0xe4   :  { %784 = vmatpush.msrb.mxu0 %v1201_v47  ;;  %634 = vmatpush.msra.mxu1 %v1193_v45 }
  0xe5   :  { %716 = vmatpush.msra.mxu2 %v693_v9  ;;  %759 = vmatpush.msra.mxu3 %v1181_v42  ;;  %v392_v42 = vld [vmem:[%s1419_s5] sm:$0x1] }
  0xe6   :  { %785 = vmatpush.msrb.mxu0 %v1205_v48  ;;  %635 = vmatpush.msra.mxu1 %v1197_v46 }
  0xe7   :  { %760 = vmatpush.msra.mxu3 %v1185_v43  ;;  %717 = vmatpush.msra.mxu2 %v692_v14 }
  0xe8   :  { %786 = vmatpush.msrb.mxu0 %v1209_v49  ;;  %636 = vmatpush.msra.mxu1 %v1201_v47 }
  0xe9   :  { %761 = vmatpush.msra.mxu3 %v1189_v44  ;;  %718 = vmatpush.msra.mxu2 %v691_v16 }
  0xea   :  { %787 = vmatpush.msrb.mxu0 %v1213_v52  ;;  %637 = vmatpush.msra.mxu1 %v1205_v48 }
  0xeb   :  { %762 = vmatpush.msra.mxu3 %v1193_v45  ;;  %v690_v45 = vld [vmem:[#allocation10 + $0x18] sm:$0xff] }
  0xec   :  { %788 = vmatpush.msrb.mxu0 %v1217_v53  ;;  %638 = vmatpush.msra.mxu1 %v1209_v49 }
  0xed   :  { %763 = vmatpush.msra.mxu3 %v1197_v46  ;;  %719 = vmatpush.msra.mxu2 %v690_v45 }
  0xee   :  { %789 = vmatpush.msrb.mxu0 %v1221_v54  ;;  %639 = vmatpush.msra.mxu1 %v1213_v52 }
  0xef   :  { %764 = vmatpush.msra.mxu3 %v1201_v47  ;;  %720 = vmatpush.msra.mxu2 %v689_v28 }
  0xf0   :  { %790 = vmatpush.msrb.mxu0 %v1223_v55  ;;  %640 = vmatpush.msra.mxu1 %v1217_v53 }
  0xf1   :  { %765 = vmatpush.msra.mxu3 %v1205_v48  ;;  %v688_v48 = vld [vmem:[#allocation10 + $0x8] sm:$0xff] }
  0xf2   :  { %791 = vmatpush.msrb.mxu0 %v1227_v57  ;;  %641 = vmatpush.msra.mxu1 %v1221_v54 }
  0xf3   :  { %766 = vmatpush.msra.mxu3 %v1209_v49  ;;  %721 = vmatpush.msra.mxu2 %v688_v48 }
  0xf4   :  { %792 = vmatpush.msrb.mxu0 %v1231_v60  ;;  %642 = vmatpush.msra.mxu1 %v1223_v55 }
  0xf5   :  { %767 = vmatpush.msra.mxu3 %v1213_v52 }
  0xf6   :  { %793 = vmatpush.msrb.mxu0 %v1235_v61  ;;  %643 = vmatpush.msra.mxu1 %v1227_v57 }
  0xf7   :  { %768 = vmatpush.msra.mxu3 %v1217_v53 }
  0xf8   :  { %644 = vmatpush.msra.mxu1 %v1231_v60 }
  0xf9   :  { %769 = vmatpush.msra.mxu3 %v1221_v54 }
  0xfa   :  { %645 = vmatpush.msra.mxu1 %v1235_v61 }
  0xfb   :  { %770 = vmatpush.msra.mxu3 %v1223_v55 }
  0xfd   :  { %771 = vmatpush.msra.mxu3 %v1227_v57 }
  0xff   :  { %772 = vmatpush.msra.mxu3 %v1231_v60 }
 0x101   :  { %773 = vmatpush.msra.mxu3 %v1235_v61 }
 0x154   :  { %v371_v35 = vpop.f32.mrf.mxu0 }
 0x158   :  { %v1293_v30 = vpop.f32.mrf.mxu3 }
 0x159   :  { %v374_v34 = vmul.f32 %v1293_v30, %v1293_v30  ;;  %v387_v41 = vperm.slane %v1293_v30, 0 }
 0x15b   :  { %v375_v39 = vsub.f32 %v371_v35, %v374_v34  ;;  %v388_v23 = vsub.f32 %v1248_v6, %v387_v41  ;;  %v389_v24 = vsub.f32 %v1245_v5, %v387_v41  ;;  %v390_v25 = vsub.f32 %v1250_v7, %v387_v41  ;;  %v687_v35 = vld [vmem:[#allocation10] sm:$0xff] }
 0x15c   :  { %v391_v44 = vsub.f32 %v1264_v20, %v387_v41  ;;  %722 = vmatpush.msra.mxu2 %v687_v35 }
 0x15d   :  { %v376_v56 = vadd.f32 1e-05, %v375_v39 }
 0x15f   :  { %892 = vrsqrt.f32 %v376_v56  ;;  %vm383_vm3 = vweird.f32 %v376_v56 }
 0x165   :  { %v893_v8 = vpop.eup %892 }
 0x166   :  { %v378_v10 = vmul.f32 %v893_v8, %v376_v56  ;;  %vm384_vm2 = vweird.f32 %v893_v8 }
 0x167   :  { %vm385_vm4 = vmor %vm383_vm3, %vm384_vm2 }
 0x168   :  { %v379_v11 = vmul.f32 %v893_v8, %v378_v10 }
 0x16a   :  { %v380_v12 = vmul.f32 0.5, %v379_v11 }
 0x16c   :  { %v381_v13 = vsub.f32 1.5, %v380_v12 }
 0x16e   :  { %v382_v17 = vmul.f32 %v893_v8, %v381_v13 }
 0x170   :  { %v386_v43 = vsel %vm385_vm4, %v893_v8, %v382_v17 }
 0x171   :  { %v393_v19 = vmul.f32 %v392_v42, %v386_v43 }
 0x173   :  { %v394_v26 = vperm.slane %v393_v19, 0 }
 0x175   :  { %v395_v6 = vmul.f32 %v394_v26, %v388_v23  ;;  %v396_v29 = vmul.f32 %v394_v26, %v389_v24  ;;  %v397_v46 = vmul.f32 %v394_v26, %v390_v25  ;;  %v398_v30 = vmul.f32 %v394_v26, %v391_v44 }
 0x177   :  { %v403_v5 = vadd.f32 %v889_v27, %v395_v6  ;;  %v404_v7 = vadd.f32 %v889_v27, %v396_v29  ;;  %v405_v20 = vadd.f32 %v889_v27, %v397_v46  ;;  %v406_v31 = vadd.f32 %v889_v27, %v398_v30 }
 0x179   :  { %v407_v32 = vmax.f32 %v403_v5, 0.0  ;;  %v408_v47 = vmax.f32 %v404_v7, 0.0  ;;  %v409_v33 = vmax.f32 %v405_v20, 0.0  ;;  %v410_v34 = vmax.f32 %v406_v31, 0.0 }
 0x17b   :  { %411 = vst [vmem:[#allocation3 + $0x1] sm:$0xff] %v407_v32  ;;  %476 = vmatmul.f32.vlgmr.msrb.gmra.mxu1 %v407_v32 }
 0x17c   :  { %412 = vst [vmem:[#allocation3 + $0x9] sm:$0xff] %v408_v47 }
 0x17d   :  { %413 = vst [vmem:[#allocation3 + $0x19] sm:$0xff] %v409_v33 }
 0x17e   :  { %414 = vst [vmem:[#allocation3 + $0x21] sm:$0xff] %v410_v34 }
 0x182   :  { %v419_v49 = vld [vmem:[#allocation3] sm:$0xff] }
 0x183   :  { %505 = vmatmul.f32.vlgmr.msrb.gmra.mxu2 %v419_v49  ;;  %v518_v52 = vld [vmem:[#allocation3 + $0x2] sm:$0xff]  ;;  %479 = vmatmul.f32.gmra.mxu1 %v408_v47  ;;  %v519_v36 = vld [vmem:[#allocation3 + $0xa] sm:$0xff] }
 0x184   :  { %555 = vmatmul.f32.vlgmr.msrb.gmra.mxu3 %v518_v52  ;;  %v420_v53 = vld [vmem:[#allocation3 + $0x8] sm:$0xff]  ;;  %v421_v54 = vld [vmem:[#allocation3 + $0x18] sm:$0xff] }
 0x185   :  { %v520_v37 = vld [vmem:[#allocation3 + $0x1a] sm:$0xff]  ;;  %v521_v57 = vld [vmem:[#allocation3 + $0x22] sm:$0xff] }
 0x186   :  { %v422_v55 = vld [vmem:[#allocation3 + $0x20] sm:$0xff] }
 0x18b   :  { %508 = vmatmul.f32.gmra.mxu2 %v420_v53  ;;  %482 = vmatmul.f32.gmra.mxu1 %v409_v33 }
 0x18c   :  { %558 = vmatmul.f32.gmra.mxu3 %v519_v36 }
 0x193   :  { %511 = vmatmul.f32.gmra.mxu2 %v421_v54  ;;  %485 = vmatmul.f32.gmra.mxu1 %v410_v34 }
 0x194   :  { %561 = vmatmul.f32.gmra.mxu3 %v520_v37 }
 0x19b   :  { %514 = vmatmul.f32.gmra.mxu2 %v422_v55 }
 0x19c   :  { %564 = vmatmul.f32.gmra.mxu3 %v521_v57 }
 0x1a3   :  { %876 = vmatmul.msk.f32.vlgmr.msra.gmra.mxu2 %vm121_vm1, %v1149_v15 }
 0x1ab   :  { %877 = vmatmul.msk.f32.gmra.mxu2 %vm121_vm1, %v1151_v18 }
 0x1b3   :  { %878 = vmatmul.msk.f32.gmra.mxu2 %vm121_vm1, %v1157_v21 }
 0x1bb   :  { %879 = vmatmul.msk.f32.gmra.mxu2 %vm121_vm1, %v1159_v22 }
 0x1f8   :  { %v477_v60 = vpop.f32.mrf.mxu1 }
 0x200   :  { %v480_v39 = vpop.f32.mrf.mxu1 }
 0x206   :  { %v506_v61 = vpop.f32.mrf.mxu2 }
 0x207   :  { %v556_v38 = vpop.f32.mrf.mxu3  ;;  %v507_v59 = vadd.f32 %v506_v61, %v477_v60 }
 0x208   :  { %v483_v51 = vpop.f32.mrf.mxu1 }
 0x209   :  { %v1350_v18 = vadd.f32 %v556_v38, %v507_v59 }
 0x20b   :  { %v581_v2 = vmul.f32 %v1350_v18, %v1350_v18 }
 0x20e   :  { %v509_v40 = vpop.f32.mrf.mxu2 }
 0x20f   :  { %v559_v50 = vpop.f32.mrf.mxu3  ;;  %v510_v56 = vadd.f32 %v509_v40, %v480_v39 }
 0x210   :  { %v486_v0 = vpop.f32.mrf.mxu1 }
 0x211   :  { %v1348_v63 = vadd.f32 %v559_v50, %v510_v56 }
 0x213   :  { %v582_v22 = vmul.f32 %v1348_v63, %v1348_v63  ;;  %v572_v3 = vadd.f32 %v1348_v63, %v1350_v18 }
 0x215   :  { %v585_v10 = vadd.f32 %v582_v22, %v581_v2 }
 0x216   :  { %v512_v58 = vpop.f32.mrf.mxu2 }
 0x217   :  { %v513_v15 = vadd.f32 %v512_v58, %v483_v51  ;;  %v562_v62 = vpop.f32.mrf.mxu3 }
 0x219   :  { %v1352_v21 = vadd.f32 %v562_v62, %v513_v15 }
 0x21b   :  { %v583_v4 = vmul.f32 %v1352_v21, %v1352_v21  ;;  %v573_v11 = vadd.f32 %v572_v3, %v1352_v21 }
 0x21d   :  { %v586_v13 = vadd.f32 %v585_v10, %v583_v4 }
 0x21e   :  { %v515_v1 = vpop.f32.mrf.mxu2 }
 0x21f   :  { %v516_v8 = vadd.f32 %v515_v1, %v486_v0  ;;  %v565_v9 = vpop.f32.mrf.mxu3 }
 0x221   :  { %v1363_v12 = vadd.f32 %v565_v9, %v516_v8 }
 0x223   :  { %v574_v14 = vadd.f32 %v573_v11, %v1363_v12  ;;  %v584_v16 = vmul.f32 %v1363_v12, %v1363_v12 }
 0x225   :  { %v575_v17 = vrot.slane %v574_v14, 4  ;;  %v587_v41 = vadd.f32 %v586_v13, %v584_v16  ;;  %v668_v13 = vld [vmem:[%s1421_s7] sm:$0x1] }
 0x226   :  { %v1368_v42 = vpop.f32.mrf.mxu2 }
 0x227   :  { %v576_v43 = vadd.f32 %v575_v17, %v574_v14  ;;  %v588_v19 = vrot.slane %v587_v41, 4  ;;  %v745_v5 = vmul.f32 %v1368_v42, %v1368_v42 }
 0x229   :  { %v577_v23 = vrot.slane %v576_v43, 2  ;;  %v589_v24 = vadd.f32 %v588_v19, %v587_v41 }
 0x22b   :  { %v578_v25 = vadd.f32 %v577_v23, %v576_v43  ;;  %v590_v44 = vrot.slane %v589_v24, 2 }
 0x22d   :  { %v579_v26 = vrot.slane %v578_v25, 1  ;;  %v591_v27 = vadd.f32 %v590_v44, %v589_v24  ;;  %v816_v44 = vld [vmem:[%s1423_s9] sm:$0x1] }
 0x22e   :  { %v1370_v45 = vpop.f32.mrf.mxu2 }
 0x22f   :  { %v580_v28 = vadd.f32 %v579_v26, %v578_v25  ;;  %v592_v6 = vrot.slane %v591_v27, 1  ;;  %v746_v30 = vmul.f32 %v1370_v45, %v1370_v45  ;;  %v736_v7 = vadd.f32 %v1370_v45, %v1368_v42 }
 0x231   :  { %626 = vmatmul.f32.vlgmr.msra.gmra.mxu0 %v580_v28  ;;  %v593_v29 = vadd.f32 %v592_v6, %v591_v27  ;;  %v749_v31 = vadd.f32 %v746_v30, %v745_v5 }
 0x233   :  { %646 = vmatmul.f32.vlgmr.msra.gmra.mxu1 %v593_v29 }
 0x236   :  { %v1372_v46 = vpop.f32.mrf.mxu2 }
 0x237   :  { %v747_v20 = vmul.f32 %v1372_v46, %v1372_v46  ;;  %v737_v32 = vadd.f32 %v736_v7, %v1372_v46 }
 0x239   :  { %v750_v33 = vadd.f32 %v749_v31, %v747_v20 }
 0x23e   :  { %v1383_v47 = vpop.f32.mrf.mxu2 }
 0x23f   :  { %v738_v34 = vadd.f32 %v737_v32, %v1383_v47  ;;  %v748_v48 = vmul.f32 %v1383_v47, %v1383_v47 }
 0x241   :  { %v739_v35 = vrot.slane %v738_v34, 4  ;;  %v751_v49 = vadd.f32 %v750_v33, %v748_v48  ;;  %v891_v33 = vld [vmem:[%s1422_s8] ss:$0 sm:$0xff]  ;;  %s1058_s8 = smov [#allocation13]  }
 0x243   :  { %v740_v52 = vadd.f32 %v739_v35, %v738_v34  ;;  %v752_v53 = vrot.slane %v751_v49, 4 }
 0x245   :  { %v741_v36 = vrot.slane %v740_v52, 2  ;;  %v753_v54 = vadd.f32 %v752_v53, %v751_v49 }
 0x247   :  { %v742_v37 = vadd.f32 %v741_v36, %v740_v52  ;;  %v754_v55 = vrot.slane %v753_v54, 2 }
 0x249   :  { %v743_v57 = vrot.slane %v742_v37, 1  ;;  %v755_v60 = vadd.f32 %v754_v55, %v753_v54 }
 0x24b   :  { %v744_v61 = vadd.f32 %v743_v57, %v742_v37  ;;  %v756_v38 = vrot.slane %v755_v60, 1 }
 0x24d   :  { %774 = vmatmul.f32.vlgmr.msra.gmra.mxu3 %v744_v61  ;;  %v757_v39 = vadd.f32 %v756_v38, %v755_v60 }
 0x24f   :  { %794 = vmatmul.f32.vlgmr.msrb.gmra.mxu0 %v757_v39 }
 0x2ae   :  { %v627_v40 = vpop.f32.mrf.mxu0 }
 0x2af   :  { %v650_v50 = vmul.f32 %v627_v40, %v627_v40  ;;  %v663_v43 = vperm.slane %v627_v40, 0 }
 0x2b0   :  { %v647_v51 = vpop.f32.mrf.mxu1 }
 0x2b1   :  { %v651_v56 = vsub.f32 %v647_v51, %v650_v50  ;;  %v664_v26 = vsub.f32 %v1350_v18, %v663_v43  ;;  %v665_v27 = vsub.f32 %v1348_v63, %v663_v43  ;;  %v666_v28 = vsub.f32 %v1352_v21, %v663_v43 }
 0x2b2   :  { %v667_v6 = vsub.f32 %v1363_v12, %v663_v43  ;;  %v890_v12 = vld [vmem:[%s1424_s10] ss:$0 sm:$0xff]  ;;  %s847_s10 = sshll.u32 %s1058_s8, 4  ;;  %s848_s10 = int_to_ptr.vmem [resolvable:$true] %s847_s10 }
 0x2b3   :  { %v652_v58 = vadd.f32 1e-05, %v651_v56 }
 0x2b5   :  { %894 = vrsqrt.f32 %v652_v58  ;;  %vm659_vm6 = vweird.f32 %v652_v58 }
 0x2bb   :  { %v895_v59 = vpop.eup %894 }
 0x2bc   :  { %v654_v15 = vmul.f32 %v895_v59, %v652_v58  ;;  %vm660_vm5 = vweird.f32 %v895_v59 }
 0x2bd   :  { %vm661_vm7 = vmor %vm659_vm6, %vm660_vm5 }
 0x2be   :  { %v655_v62 = vmul.f32 %v895_v59, %v654_v15 }
 0x2c0   :  { %v656_v1 = vmul.f32 0.5, %v655_v62 }
 0x2c2   :  { %v657_v8 = vsub.f32 1.5, %v656_v1 }
 0x2c4   :  { %v658_v9 = vmul.f32 %v895_v59, %v657_v8 }
 0x2c6   :  { %v662_v11 = vsel %vm661_vm7, %v895_v59, %v658_v9 }
 0x2c7   :  { %v669_v17 = vmul.f32 %v668_v13, %v662_v11 }
 0x2c9   :  { %v670_v23 = vperm.slane %v669_v17, 0 }
 0x2cb   :  { %v671_v5 = vmul.f32 %v670_v23, %v664_v26  ;;  %v672_v20 = vmul.f32 %v670_v23, %v665_v27  ;;  %v673_v31 = vmul.f32 %v670_v23, %v666_v28  ;;  %v674_v32 = vmul.f32 %v670_v23, %v667_v6 }
 0x2cc   :  { %v795_v2 = vpop.f32.mrf.mxu0 }
 0x2cd   :  { %v679_v52 = vadd.f32 %v891_v33, %v671_v5  ;;  %v680_v53 = vadd.f32 %v891_v33, %v672_v20  ;;  %v681_v36 = vadd.f32 %v891_v33, %v673_v31  ;;  %v682_v54 = vadd.f32 %v891_v33, %v674_v32 }
 0x2d0   :  { %v775_v22 = vpop.f32.mrf.mxu3 }
 0x2d1   :  { %v798_v0 = vmul.f32 %v775_v22, %v775_v22  ;;  %v811_v25 = vperm.slane %v775_v22, 0 }
 0x2d3   :  { %v799_v3 = vsub.f32 %v795_v2, %v798_v0  ;;  %v812_v7 = vsub.f32 %v1368_v42, %v811_v25  ;;  %v813_v18 = vsub.f32 %v1370_v45, %v811_v25  ;;  %v814_v63 = vsub.f32 %v1372_v46, %v811_v25 }
 0x2d4   :  { %v815_v21 = vsub.f32 %v1383_v47, %v811_v25 }
 0x2d5   :  { %v800_v4 = vadd.f32 1e-05, %v799_v3 }
 0x2d7   :  { %896 = vrsqrt.f32 %v800_v4  ;;  %vm807_vm9 = vweird.f32 %v800_v4 }
 0x2dd   :  { %v897_v10 = vpop.eup %896 }
 0x2de   :  { %v802_v14 = vmul.f32 %v897_v10, %v800_v4  ;;  %vm808_vm8 = vweird.f32 %v897_v10 }
 0x2df   :  { %vm809_vm10 = vmor %vm807_vm9, %vm808_vm8 }
 0x2e0   :  { %v803_v16 = vmul.f32 %v897_v10, %v802_v14 }
 0x2e2   :  { %v804_v41 = vmul.f32 0.5, %v803_v16 }
 0x2e4   :  { %v805_v19 = vsub.f32 1.5, %v804_v41 }
 0x2e6   :  { %v806_v24 = vmul.f32 %v897_v10, %v805_v19 }
 0x2e8   :  { %v810_v29 = vsel %vm809_vm10, %v897_v10, %v806_v24 }
 0x2e9   :  { %v817_v30 = vmul.f32 %v816_v44, %v810_v29 }
 0x2eb   :  { %v818_v34 = vperm.slane %v817_v30, 0 }
 0x2ed   :  { %v819_v48 = vmul.f32 %v818_v34, %v812_v7  ;;  %v820_v42 = vmul.f32 %v818_v34, %v813_v18  ;;  %v821_v35 = vmul.f32 %v818_v34, %v814_v63  ;;  %v822_v49 = vmul.f32 %v818_v34, %v815_v21 }
 0x2ef   :  { %v827_v37 = vadd.f32 %v890_v12, %v819_v48  ;;  %v828_v55 = vadd.f32 %v890_v12, %v820_v42  ;;  %v829_v45 = vadd.f32 %v890_v12, %v821_v35  ;;  %v830_v57 = vadd.f32 %v890_v12, %v822_v49 }
 0x2f1   :  { %v831_v46 = vadd.f32 %v827_v37, %v679_v52  ;;  %v832_v60 = vadd.f32 %v828_v55, %v680_v53  ;;  %v833_v47 = vadd.f32 %v829_v45, %v681_v36  ;;  %v834_v61 = vadd.f32 %v830_v57, %v682_v54 }
 0x2f3   :  { %v835_v38 = vmax.f32 %v831_v46, 0.0  ;;  %v836_v39 = vmax.f32 %v832_v60, 0.0  ;;  %v837_v40 = vmax.f32 %v833_v47, 0.0  ;;  %v838_v50 = vmax.f32 %v834_v61, 0.0 }
 0x2f5   :  { %839 = vst [vmem:[#allocation13] sm:$0xff] %v835_v38 }
 0x2f6   :  { %840 = vst [vmem:[#allocation13 + $0x8] sm:$0xff] %v836_v39 }
 0x2f7   :  { %841 = vst [vmem:[#allocation13 + $0x10] sm:$0xff] %v837_v40 }
 0x2f8   :  { %842 = vst [vmem:[#allocation13 + $0x18] sm:$0xff] %v838_v50 }
 0x2f9   :  { %855 = dma.vmem_to_hbm [thread:$0]  %s848_s10, 512, %s850_s3, [#allocation6], %s1051_s25, %s1051_s25, %s1052_s26  }
 0x2fa   :  { %1048 = dma.done.wait [#allocation6], 512  }
 0x2fb   :  { %1049 = vsyncadd [#allocation6], 4294966784 }
 0x2fc   :  { %860 = vsyncpa [#allocation5], 1 }
 0x2fd   :  { %861 = vsyncpa [#allocation8], 1 }
 0x2fe   :  { %862 = vsyncpa [#allocation11], 1 }
 0x2ff   :  { %863 = vsyncpa [#allocation6], 1 }

</bundles_post_ra>
